<compile_context>
chip_gen: v6e
topology: v6e:2x2x1
jax: 0.10.0
libtpu: 0.0.40
codegen_flags: <defaults>
</compile_context>

<pallas_src>
import math

import jax
import jax.numpy as jnp
from jax.experimental import pallas as pl
from jax.experimental.pallas import tpu as pltpu


def _round_up(x, m):
    return ((x + m - 1) // m) * m


def _pack_factor(cin, cout, weight_itemsize, max_weight_bytes=4 << 20):
    """Smallest row-pack factor making pack*cin AND pack*cout multiples of 128.

    Falls back to input-only lane density, then to no packing, if the
    block-diagonal kron weight would exceed `max_weight_bytes` of VMEM.
    """
    need_in = 128 // math.gcd(cin, 128)
    need_out = 128 // math.gcd(cout, 128)
    for p in (math.lcm(need_in, need_out), need_in, 1):
        if (p * cin) * (p * cout) * weight_itemsize <= max_weight_bytes:
            return p
    return 1


def _fused_fc_kernel(x_ref, w_ref, b_ref, o_ref):
    """One (tmp, pack*Cin) tile: x @ kron(I_pack, W') + bias -> ReLU.

    Weights are block-diagonal so every packed row maps `pack` voxels through
    the same Linear(+folded BN); output rows are lane-dense multiples of 128.
    """
    y = jnp.dot(x_ref[...], w_ref[...], preferred_element_type=jnp.float32)
    y = y + b_ref[...]                     # Linear bias + BatchNorm (eval) folded, f32
    o_ref[...] = jnp.maximum(y, 0.0).astype(o_ref.dtype)   # ReLU, narrow writeback


def sparse_extraction_pointnet(voxel_coords, voxel_features, spatial_features_2d,
                               params, *, compute_dtype=jnp.bfloat16,
                               out_dtype=jnp.bfloat16):
    """JAX/Pallas equivalent of SparseExtractionPointNet.forward.

    Args:
      voxel_coords:        (N, 4) int32, columns [batch, z, y, x]
      voxel_features:      (N, C_pp) float32
      spatial_features_2d: (B, C_sp, H, W) float32  (NCHW)
      params: dict with fc_w (Cout, Cin), fc_b (Cout,), bn_gamma, bn_beta,
              bn_mean, bn_var (Cout,), bn_eps (python float)
      compute_dtype: matmul-operand dtype (bf16 default; accumulation is f32)
      out_dtype:     writeback dtype (bf16 default)
    Returns:
      point_features: (N, Cout) of out_dtype
    """
    # ---- glue: BEV gather (data-dependent indexing) -------------------------
    b = voxel_coords[:, 0].astype(jnp.int32)
    yy = voxel_coords[:, 2].astype(jnp.int32)
    xx = voxel_coords[:, 3].astype(jnp.int32)
    sp_nhwc = jnp.transpose(spatial_features_2d, (0, 2, 3, 1))   # (B, H, W, C_sp)
    gathered = sp_nhwc[b, yy, xx]                                # (N, C_sp)
    # TODO(synk): at production BEV sizes, fuse this gather (and drop the NCHW
    # transpose by keeping the map NHWC upstream) into the kernel via
    # scalar-prefetched flat indices / pl.Element row blocks.

    N, C_pp = voxel_features.shape
    C_sp = gathered.shape[1]
    Cout, Cin = params['fc_w'].shape
    assert Cin == C_pp + C_sp

    # ---- glue: fold Linear bias + BatchNorm1d (eval mode) into W / bias -----
    # TODO(synk): training-mode BatchNorm1d (batch statistics of the linear
    # output) is not reproduced; running stats are folded (eval mode).
    inv_std = jax.lax.rsqrt(params['bn_var'].astype(jnp.float32)
                            + jnp.float32(params['bn_eps']))
    scale = params['bn_gamma'].astype(jnp.float32) * inv_std            # (Cout,)
    w_eff = params['fc_w'].astype(jnp.float32) * scale[:, None]         # (Cout, Cin)
    bias_eff = ((params['fc_b'].astype(jnp.float32)
                 - params['bn_mean'].astype(jnp.float32)) * scale
                + params['bn_beta'].astype(jnp.float32))                # (Cout,)

    # one small concat in the wrapper (touches only N*Cin bytes) so the kernel
    # runs a single fused matmul instead of two dots + add
    x = jnp.concatenate([voxel_features, gathered], axis=1).astype(compute_dtype)

    # ---- lane-dense packing: fold `pack` voxels into one 128-lane row -------
    in_itemsize = jnp.dtype(compute_dtype).itemsize
    out_itemsize = jnp.dtype(out_dtype).itemsize
    pack = _pack_factor(Cin, Cout, in_itemsize)

    w_t = w_eff.T                                                # (Cin, Cout)
    if pack > 1:
        w_bd = jnp.kron(jnp.eye(pack, dtype=jnp.float32), w_t)  # (pack*Cin, pack*Cout)
    else:
        w_bd = w_t
    w_bd = w_bd.astype(compute_dtype)
    bias_t = jnp.tile(bias_eff, pack).reshape(1, pack * Cout)   # f32

    # ---- minimal pad + packed reshape ---------------------------------------
    n_pad = _round_up(N, 8 * pack)          # packed-row count stays 8-aligned
    rows0 = n_pad // pack
    x_p = jnp.pad(x, ((0, n_pad - N), (0, 0))).reshape(rows0, pack * Cin)

    # ---- row tiling: ~6 MiB of streamed blocks per step, even grid ----------
    step_bytes_per_row = pack * (Cin * in_itemsize + Cout * out_itemsize)
    tmp_max = max(8, ((6 << 20) // step_bytes_per_row) // 8 * 8)
    grid_n = pl.cdiv(rows0, tmp_max)
    if grid_n == 1 and rows0 >= 16:
        grid_n = 2                          # let both v7x TensorCores work
    if grid_n > 1 and grid_n % 2:
        grid_n += 1                         # even grid -> balanced megacore shards
    tmp = min(rows0, max(8, _round_up(pl.cdiv(rows0, grid_n), 8)))
    grid_n = pl.cdiv(rows0, tmp)            # last block may be partial (OK)

    block_bytes = tmp * pack * (Cin * in_itemsize + Cout * out_itemsize)
    resident_bytes = (pack * Cin) * (pack * Cout) * in_itemsize + pack * Cout * 4
    vmem_limit = int(min(48 << 20,
                         max(2 * block_bytes + resident_bytes + (8 << 20), 32 << 20)))

    out = pl.pallas_call(
        _fused_fc_kernel,
        out_shape=jax.ShapeDtypeStruct((rows0, pack * Cout), out_dtype),
        grid_spec=pltpu.PrefetchScalarGridSpec(
            num_scalar_prefetch=0,
            grid=(grid_n,),
            in_specs=[
                pl.BlockSpec((tmp, pack * Cin), lambda i: (i, 0)),
                pl.BlockSpec((pack * Cin, pack * Cout), lambda i: (0, 0)),
                pl.BlockSpec((1, pack * Cout), lambda i: (0, 0)),
            ],
            out_specs=pl.BlockSpec((tmp, pack * Cout), lambda i: (i, 0)),
        ),
        compiler_params=pltpu.CompilerParams(
            dimension_semantics=("parallel",),
            vmem_limit_bytes=vmem_limit),
    )(x_p, w_bd, bias_t)

    # un-pack: (rows0, pack*Cout) -> (n_pad, Cout) is a free row-major view.
    # TODO(synk): return the padded layout (and slice at the consumer) to avoid
    # the [:N] copy when N is not a multiple of 8*pack.
    return out.reshape(n_pad, Cout)[:N]


def _reference(voxel_coords, voxel_features, spatial_features_2d, params):
    b = voxel_coords[:, 0].astype(jnp.int32)
    yy = voxel_coords[:, 2].astype(jnp.int32)
    xx = voxel_coords[:, 3].astype(jnp.int32)
    sp = jnp.transpose(spatial_features_2d, (0, 2, 3, 1))[b, yy, xx]
    x = jnp.concatenate([voxel_features, sp], axis=1)
    z = x @ params['fc_w'].T + params['fc_b']
    z = (z - params['bn_mean']) / jnp.sqrt(params['bn_var'] + params['bn_eps'])
    z = z * params['bn_gamma'] + params['bn_beta']
    return jnp.maximum(z, 0.0)


if __name__ == "__main__":
    key = jax.random.PRNGKey(0)
    k = jax.random.split(key, 10)

    # small shapes consistent with the module
    B, C_sp, H, W = 2, 4, 16, 16      # spatial_features_2d: (2, 4, 16, 16)
    C_pp = 4                          # voxel_features per-point channels
    N = 200                           # number of voxels (exercises padding)
    IN_CHANNEL = C_pp + C_sp          # 8
    OUT_CHANNEL = 32

    spatial_features_2d = jax.random.normal(k[0], (B, C_sp, H, W), jnp.float32)
    voxel_features = jax.random.normal(k[1], (N, C_pp), jnp.float32)
    voxel_coords = jnp.stack([
        jax.random.randint(k[2], (N,), 0, B),     # batch
        jnp.zeros((N,), jnp.int32),               # z (unused by forward)
        jax.random.randint(k[3], (N,), 0, H),     # y
        jax.random.randint(k[4], (N,), 0, W),     # x
    ], axis=1).astype(jnp.int32)

    params = {
        'fc_w': 0.1 * jax.random.normal(k[5], (OUT_CHANNEL, IN_CHANNEL),
                                        jnp.float32),
        'fc_b': 0.05 * jax.random.normal(k[6], (OUT_CHANNEL,), jnp.float32),
        'bn_gamma': 1.0 + 0.1 * jax.random.normal(k[7], (OUT_CHANNEL,),
                                                  jnp.float32),
        'bn_beta': 0.1 * jax.random.normal(k[8], (OUT_CHANNEL,), jnp.float32),
        'bn_mean': 0.01 * jax.random.normal(k[9], (OUT_CHANNEL,), jnp.float32),
        'bn_var': jnp.ones((OUT_CHANNEL,), jnp.float32),
        'bn_eps': 1e-5,
    }

    out = sparse_extraction_pointnet(voxel_coords, voxel_features,
                                     spatial_features_2d, params)
    out = jax.block_until_ready(out)

    ref = _reference(voxel_coords, voxel_features, spatial_features_2d, params)
    assert out.shape == (N, OUT_CHANNEL)
    # bf16 operands + bf16 writeback -> loosened tolerance vs the f32 reference
    assert jnp.allclose(out.astype(jnp.float32), ref, atol=5e-2, rtol=5e-2)
    print("KERNEL_OK")
</pallas_src>

<mosaic_0001>
module attributes {stable_mosaic.version = 11 : i64} {
  func.func @_fused_fc_kernel(%arg0: i32, %arg1: memref<8x128xbf16, #tpu.memory_space<vmem>>, %arg2: memref<128x512xbf16, #tpu.memory_space<vmem>>, %arg3: memref<1x512xf32, #tpu.memory_space<vmem>>, %arg4: memref<8x512xbf16, #tpu.memory_space<vmem>>) attributes {dimension_semantics = [#tpu.dimension_semantics<parallel>], iteration_bounds = array<i64: 2>, scalar_prefetch = 0 : i64, scratch_operands = 0 : i64, tpu.core_type = #tpu.core_type<tc>, window_params = [{transform_indices = @transform_0, window_bounds = array<i64: 8, 128>}, {pipeline_mode = #tpu.pipeline_mode<synchronous>, transform_indices = @transform_1, window_bounds = array<i64: 128, 512>}, {pipeline_mode = #tpu.pipeline_mode<synchronous>, transform_indices = @transform_2, window_bounds = array<i64: 1, 512>}, {transform_indices = @transform_3, window_bounds = array<i64: 8, 512>}]} {
    %c0 = arith.constant 0 : index
    %c0_0 = arith.constant 0 : index
    %0 = vector.load %arg1[%c0, %c0_0] : memref<8x128xbf16, #tpu.memory_space<vmem>>, vector<8x128xbf16>
    %c0_1 = arith.constant 0 : index
    %c0_2 = arith.constant 0 : index
    %1 = vector.load %arg2[%c0_1, %c0_2] : memref<128x512xbf16, #tpu.memory_space<vmem>>, vector<128x512xbf16>
    %cst = arith.constant dense<0.000000e+00> : vector<8x512xf32>
    %2 = tpu.matmul %0, %1, %cst {dimension_numbers = #tpu.dot_dimension_numbers<[1], [0], [0], [1], [0, 0, 1, 1], [], []>} : vector<8x128xbf16>, vector<128x512xbf16>, vector<8x512xf32> -> vector<8x512xf32>
    %c0_3 = arith.constant 0 : index
    %c0_4 = arith.constant 0 : index
    %3 = vector.load %arg3[%c0_3, %c0_4] : memref<1x512xf32, #tpu.memory_space<vmem>>, vector<1x512xf32>
    %4 = vector.broadcast %3 : vector<1x512xf32> to vector<8x512xf32>
    %5 = arith.addf %2, %4 : vector<8x512xf32>
    %cst_5 = arith.constant 0.000000e+00 : f32
    %6 = vector.broadcast %cst_5 : f32 to vector<8x512xf32>
    %7 = arith.maximumf %5, %6 : vector<8x512xf32>
    %8 = arith.truncf %7 : vector<8x512xf32> to vector<8x512xbf16>
    %c0_6 = arith.constant 0 : index
    %c0_7 = arith.constant 0 : index
    %9 = vector.load %arg4[%c0_6, %c0_7] : memref<8x512xbf16, #tpu.memory_space<vmem>>, vector<8x512xbf16>
    tpu.vector_store %arg4[%c0_6, %c0_7], %8 {strides = array<i32>} : memref<8x512xbf16, #tpu.memory_space<vmem>>, vector<8x512xbf16>,
    return
  }
  func.func @transform_0(%arg0: i32) -> (i32, i32) {
    %c0_i32 = arith.constant 0 : i32
    %c0_i32_0 = arith.constant 0 : i32
    return %arg0, %c0_i32 : i32, i32
  }
  func.func @transform_1(%arg0: i32) -> (i32, i32) {
    %c0_i32 = arith.constant 0 : i32
    %c0_i32_0 = arith.constant 0 : i32
    %c0_i32_1 = arith.constant 0 : i32
    return %c0_i32, %c0_i32_0 : i32, i32
  }
  func.func @transform_2(%arg0: i32) -> (i32, i32) {
    %c0_i32 = arith.constant 0 : i32
    %c0_i32_0 = arith.constant 0 : i32
    %c0_i32_1 = arith.constant 0 : i32
    return %c0_i32, %c0_i32_0 : i32, i32
  }
  func.func @transform_3(%arg0: i32) -> (i32, i32) {
    %c0_i32 = arith.constant 0 : i32
    %c0_i32_0 = arith.constant 0 : i32
    return %arg0, %c0_i32 : i32, i32
  }
}

</mosaic_0001>

<bundles_post_ra>
// kernel: tpu_custom_call.1
= control target key start
LH: loop header
LB: loop body
LE: loop exit
PB: predicated region body
PF: predicated region fallthrough
CT: control target
= control target key end

     0   :  { %8 = vsyncpa [#allocation3], 0  ;;  %s1161_s0 = inlined_call_operand.hbm [shape: bf16[16,128], index: 0, kind: input, shape index: {}]   ;;  %s1162_s1 = inlined_call_operand.hbm [shape: bf16[128,512], index: 1, kind: input, shape index: {}]   ;;  %s1163_s2 = inlined_call_operand.hbm [shape: f32[1,512], index: 2, kind: input, shape index: {}]   ;;  %s1164_s3 = inlined_call_operand.hbm [shape: bf16[16,512], index: 3, kind: output, shape index: {}]  }
   0x1   :  { %10 = vsyncpa [#allocation3 + $0x1], 0 }
   0x2   :  { %11 = vsyncpa [#allocation6], 0 }
   0x3   :  { %12 = vsyncpa [#allocation4], 0 }
   0x4   :  { %14 = vsyncpa [#allocation4 + $0x1], 0  ;;  %s986_s12 = smov 0   ;;  %s988_s13 = smov 0  }
   0x5   :  { %s990_s14 = smov 0   ;;  %s992_s15 = smov 0  }
   0x6 LB: > { %s1007_s16 = sadd.s32 4294967295, %s957_s15   ;;  %s637_s17 = sadd.s32 4294967294, %s957_s15   ;;  %s957_s15 = sphi %s992_s15, %s1186_s15   ;;  %s953_s14 = sphi %s990_s14, %s1185_s14   ;;  %s949_s13 = sphi %s988_s13, %s1184_s13   ;;  %s945_s12 = sphi %s986_s12, %s1183_s12  }
   0x7   : > { %p40_p0 = scmp.ne.s32.totalorder %s949_s13, %s945_s12  ;;  %p1165_p1 = scmp.eq.s32.totalorder %s1007_s16, 0 }
   0x8   : > { %p112_p3 = scmp.eq.s32.totalorder %s637_s17, 1  ;;  %p638_p5 = scmp.ge.s32.totalorder %s957_s15, 1 }
   0x9   : > { %p1016_p4 = por %p1165_p1, %p40_p0  ;;  %p119_p7 = scmp.lt.s32.totalorder %s957_s15, 3 }
   0xa   : > { %p1021_p6 = por %p112_p3, %p40_p0  ;;  %s959_s21 = smov [#allocation5]  }
   0xb   : > { %s1169_s18 = scalar_select %p1016_p4, 1, 0 }
   0xc   : > { %s1170_s19 = scalar_select %p1021_p6, 1, 0 }
   0xd   : > { %p1026_p8 = pnand %p638_p5, %p119_p7  ;;  %s131_s22 = sshll.u32 %s959_s21, 4  ;;  %s132_s22 = int_to_ptr.vmem [resolvable:$true] %s131_s22 }
   0xe   : > { %s960_s24 = smov [#allocation7]   ;;  %s820_s26 = scalar_lea.vmem %s132_s22, 4096 }
   0xf   : > { %s1171_s20 = scalar_select %p1026_p8, 1, 0 }
  0x10   : > { %p703_p9 = pneg %p1026_p8  ;;  %s145_s25 = sshll.u32 %s960_s24, 4  ;;  %s146_s25 = int_to_ptr.vmem [resolvable:$true] %s145_s25 }
  0x11   : > { %p821_p13 = scmp.ne.s32.totalorder %s132_s22, %s820_s26  ;;  %p828_p5 = scmp.lt.s32.totalorder %s132_s22, %s132_s22 }
  0x12   : > { %p1035_p11 = pnand %p703_p9, %p1165_p1  ;;  %p829_p7 = scmp.lt.s32.totalorder %s820_s26, %s820_s26 }
  0x14   : > { %p811_p12 = pneg %p1035_p11  ;;  %p830_p10 = por %p829_p7, %p828_p5 }
  0x16   : > { %p823_p0 = pnand %p821_p13, %p811_p12 }
  0x18   : > { %p824_p3 = pneg %p823_p0 }
  0x1a   : > { %p831_p9 = pnand %p830_p10, %p824_p3 }
  0x1c   : > { %834 = shalt.err (!%p831_p9)
}
  0x1d   : > { %s961_s27 = smov 256   ;;  %s962_s28 = smov 16  }
  0x1e   : > { %706 = dma.hbm_to_vmem [thread:$0]  (!%p1035_p11), %s1162_s1, 4096, %s132_s22, [#allocation6], %s961_s27, %s961_s27, %s962_s28  }
  0x1f   : > { %s846_s4 = scalar_lea.vmem %s146_s25, 64  ;;  %p854_p2 = scmp.lt.s32.totalorder %s146_s25, %s146_s25 }
  0x20   : > { %p847_p1 = scmp.ne.s32.totalorder %s146_s25, %s846_s4  ;;  %p855_p6 = scmp.lt.s32.totalorder %s846_s4, %s846_s4 }
  0x22   : > { %p849_p13 = pnand %p847_p1, %p811_p12  ;;  %p856_p5 = por %p855_p6, %p854_p2 }
  0x24   : > { %p850_p0 = pneg %p849_p13 }
  0x26   : > { %p857_p10 = pnand %p856_p5, %p850_p0 }
  0x28   : > { %860 = shalt.err (!%p857_p10)
}
  0x29   : > { %709 = dma.hbm_to_vmem [thread:$0]  (!%p1035_p11), %s1163_s2, 64, %s146_s25, [#allocation6]  }
  0x2a   : > { %s1058_s7 = sadd.s32 1, %s957_s15   ;;  %s27_s8 = sadd.s32 1, %s953_s14 }
  0x2b   : > { %s24_s9 = ssub.s32 %s957_s15, %s1058_s7  ;;  %p34_p1 = scmp.ne.s32.totalorder %s953_s14, %s949_s13 }
  0x2c   : > { %p25_p2 = scmp.eq.s32.totalorder %s24_s9, 0  ;;  %p35_p6 = scmp.eq.s32.totalorder %s957_s15, 0 }
  0x2d   : > { %p1173_p12 = scmp.eq.s32.totalorder %s1007_s16, 1  ;;  %p720_p7 = scmp.lt.s32.totalorder %s957_s15, 2 }
  0x2e   : > { %s1074_s11 = scalar_select %p25_p2, %s953_s14, %s27_s8  }
  0x2f   : > { %p1068_p3 = por %p1173_p12, %p34_p1  ;;  %p36_p9 = por %p35_p6, %p34_p1 }
  0x30   : > { %s156_s17 = sand.u32 1, %s953_s14   ;;  %s643_s22 = sshll.u32 %s957_s15, 6 }
  0x31   : > { %s1174_s10 = scalar_select %p1068_p3, 1, 0 }
  0x32   : > { %s642_s21 = sshll.u32 %s156_s17, 2  ;;  %s1081_s25 = scalar_lea.hbm %s1161_s0, %s643_s22 }
  0x33   : > { %s160_s26 = scalar_lea.vmem [#allocation2], %s642_s21  ;;  %p1083_p11 = pnand %p720_p7, %p36_p9 }
  0x34   : > { %s167_s27 = sshll.u32 %s160_s26, 4  ;;  %s157_s29 = scalar_lea.sflag [#allocation3], %s156_s17  ;;  %s168_s27 = int_to_ptr.vmem [resolvable:$true] %s167_s27 }
  0x35   : > { %s861_s30 = scalar_lea.hbm %s1081_s25, 64  ;;  %p863_p0 = pneg %p1083_p11 }
  0x36   : > { %p862_p13 = scmp.ne.s32.totalorder %s1081_s25, %s861_s30  ;;  %s866_s6 = scalar_lea.hbm %s1161_s0, 128 }
  0x37   : > { %p867_p1 = scmp.lt.s32.totalorder %s1081_s25, %s1161_s0  ;;  %p868_p2 = scmp.lt.s32.totalorder %s866_s6, %s861_s30 }
  0x38   : > { %p864_p5 = pnand %p863_p0, %p862_p13 }
  0x39   : > { %p869_p6 = por %p868_p2, %p867_p1 }
  0x3a   : > { %p865_p10 = pneg %p864_p5 }
  0x3c   : > { %p870_p12 = pnand %p869_p6, %p865_p10 }
  0x3e   : > { %873 = shalt.err (!%p870_p12)
}
  0x3f   : > { %s874_s21 = scalar_lea.vmem %s168_s27, 64  ;;  %s963_s17 = smov [#allocation2]  }
  0x40   : > { %p875_p7 = scmp.ne.s32.totalorder %s168_s27, %s874_s21  ;;  %s879_s22 = sshll.u32 %s963_s17, 4  ;;  %s880_s22 = int_to_ptr.vmem [resolvable:$false] %s879_s22 }
  0x41   : > { %s881_s23 = scalar_lea.vmem %s880_s22, 128  ;;  %p882_p13 = scmp.lt.s32.totalorder %s168_s27, %s880_s22 }
  0x42   : > { %p877_p9 = pnand %p875_p7, %p863_p0  ;;  %p883_p5 = scmp.lt.s32.totalorder %s881_s23, %s874_s21 }
  0x44   : > { %p878_p3 = pneg %p877_p9  ;;  %p884_p4 = por %p883_p5, %p882_p13 }
  0x46   : > { %p885_p8 = pnand %p884_p4, %p878_p3 }
  0x48   : > { %888 = shalt.err (!%p885_p8)
}
  0x49   : > { %713 = dma.hbm_to_vmem [thread:$0]  (!%p1083_p11), %s1081_s25, 64, %s168_s27, %s157_s29  }
  0x4a   : > { %p1176_p10 = scmp.ne.s32.totalorder %s1171_s20, 0 }
  0x4b   : > { %s1104_s24 = sand.u32 (!%p1176_p10), 1, %s949_s13   ;;  %p1177_p0 = scmp.ne.s32.totalorder (!%p1176_p10), %s1169_s18, 0 }
  0x4c   : > { %176 = sbr.rel (%p1176_p10) target bundleno = 333 (0x14d), region = 32  ;;  %s645_s26 = sshll.u32 (!%p1176_p10), %s1104_s24, 2 }
  0x4d   : > { %s179_s30 = scalar_lea.sflag (!%p1176_p10), [#allocation3], %s1104_s24  ;;  %s1108_s4 = scalar_lea.vmem (!%p1176_p10), [#allocation2], %s645_s26 }
  0x51   : > { %932 = dma.done.wait (%p1177_p0), %s179_s30, 64  }
  0x52   : > { %934 = vsyncadd (%p1177_p0), %s179_s30, 4294967232  ;;  %p1178_p4 = scmp.eq.s32.totalorder %s1007_s16, 0 }
  0x54   : > { %936 = dma.done.wait (%p1178_p4), [#allocation6], 4160   ;;  %p1179_p8 = pmov %p1178_p4 }
  0x55   : > { %v964_v0 = vmov 0   ;;  %v761_v1 = vld [vmem:[#allocation5 + $0xe4] ss:$16 sps:$4 sm:$0xff]   ;;  %v763_v2 = vld [vmem:[#allocation5 + $0xec] ss:$16 sps:$4 sm:$0xff]   ;;  %v249_v34 = vlaneseq  ;;  %s648_s18 = sshll.u32 %s1104_s24, 4 }
  0x56   : > { %938 = vsyncadd (%p1179_p8), [#allocation6], 4294963136  ;;  %461 = vmatprep.mubr.bf16.mxu0 %v964_v0  ;;  %502 = vmatprep.mubr.bf16.mxu1 %v964_v0  ;;  %v765_v3 = vld [vmem:[#allocation5 + $0xe0] ss:$16 sps:$4 sm:$0xff]   ;;  %v766_v4 = vld [vmem:[#allocation5 + $0xe8] ss:$16 sps:$4 sm:$0xff]  }
  0x57   : > { %429 = vmatprep.subr.bf16.mxu0 %v761_v1  ;;  %470 = vmatprep.subr.bf16.mxu1 %v763_v2  ;;  %v767_v5 = vld [vmem:[#allocation5 + $0xc4] ss:$16 sps:$4 sm:$0xff]   ;;  %v769_v6 = vld [vmem:[#allocation5 + $0xcc] ss:$16 sps:$4 sm:$0xff]   ;;  %v771_v7 = vld [vmem:[#allocation5 + $0xc0] ss:$16 sps:$4 sm:$0xff]  }
  0x58   : > { %430 = vmatpush1.bf16.msra.mxu0 %v765_v3  ;;  %471 = vmatpush1.bf16.msra.mxu1 %v766_v4  ;;  %v772_v8 = vld [vmem:[#allocation5 + $0xc8] ss:$16 sps:$4 sm:$0xff]   ;;  %v773_v9 = vld [vmem:[#allocation5 + $0xa4] ss:$16 sps:$4 sm:$0xff]   ;;  %v775_v10 = vld [vmem:[#allocation5 + $0xac] ss:$16 sps:$4 sm:$0xff]  }
  0x59   : > { %431 = vmatprep.subr.bf16.mxu0 %v767_v5  ;;  %472 = vmatprep.subr.bf16.mxu1 %v769_v6  ;;  %v777_v11 = vld [vmem:[#allocation5 + $0xa0] ss:$16 sps:$4 sm:$0xff]   ;;  %v778_v12 = vld [vmem:[#allocation5 + $0xa8] ss:$16 sps:$4 sm:$0xff]   ;;  %v779_v13 = vld [vmem:[#allocation5 + $0x84] ss:$16 sps:$4 sm:$0xff]  }
  0x5a   : > { %v781_v14 = vld [vmem:[#allocation5 + $0x8c] ss:$16 sps:$4 sm:$0xff]   ;;  %v783_v15 = vld [vmem:[#allocation5 + $0x80] ss:$16 sps:$4 sm:$0xff]   ;;  %v784_v16 = vld [vmem:[#allocation5 + $0x88] ss:$16 sps:$4 sm:$0xff]  }
  0x5b   : > { %v785_v17 = vld [vmem:[#allocation5 + $0x64] ss:$16 sps:$4 sm:$0xff]   ;;  %v787_v18 = vld [vmem:[#allocation5 + $0x6c] ss:$16 sps:$4 sm:$0xff]   ;;  %v789_v19 = vld [vmem:[#allocation5 + $0x60] ss:$16 sps:$4 sm:$0xff]  }
  0x5c   : > { %432 = vmatpush1.bf16.msra.mxu0 %v771_v7  ;;  %473 = vmatpush1.bf16.msra.mxu1 %v772_v8  ;;  %v790_v20 = vld [vmem:[#allocation5 + $0x68] ss:$16 sps:$4 sm:$0xff]   ;;  %v791_v21 = vld [vmem:[#allocation5 + $0x44] ss:$16 sps:$4 sm:$0xff]   ;;  %v793_v22 = vld [vmem:[#allocation5 + $0x4c] ss:$16 sps:$4 sm:$0xff]  }
  0x5d   : > { %433 = vmatprep.subr.bf16.mxu0 %v773_v9  ;;  %474 = vmatprep.subr.bf16.mxu1 %v775_v10  ;;  %v795_v23 = vld [vmem:[#allocation5 + $0x40] ss:$16 sps:$4 sm:$0xff]   ;;  %v796_v24 = vld [vmem:[#allocation5 + $0x48] ss:$16 sps:$4 sm:$0xff]   ;;  %v797_v25 = vld [vmem:[#allocation5 + $0x24] ss:$16 sps:$4 sm:$0xff]  }
  0x5e   : > { %v799_v26 = vld [vmem:[#allocation5 + $0x2c] ss:$16 sps:$4 sm:$0xff]   ;;  %v801_v27 = vld [vmem:[#allocation5 + $0x20] ss:$16 sps:$4 sm:$0xff]   ;;  %v802_v28 = vld [vmem:[#allocation5 + $0x28] ss:$16 sps:$4 sm:$0xff]  }
  0x5f   : > { %v803_v29 = vld [vmem:[#allocation5 + $0x4] ss:$16 sps:$4 sm:$0xff]   ;;  %v805_v30 = vld [vmem:[#allocation5 + $0xc] ss:$16 sps:$4 sm:$0xff]   ;;  %v807_v31 = vld [vmem:[#allocation5] ss:$16 sps:$4 sm:$0xff]  }
  0x60   : > { %434 = vmatpush1.bf16.msra.mxu0 %v777_v11  ;;  %475 = vmatpush1.bf16.msra.mxu1 %v778_v12  ;;  %v808_v32 = vld [vmem:[#allocation5 + $0x8] ss:$16 sps:$4 sm:$0xff]   ;;  %v250_v35 = vshrl.u32 %v249_v34, 7  ;;  %v247_v38 = vld [vmem:[#allocation7] sm:$0xf]  ;;  %s690_s20 = sshll.u32 %s1007_s16, 8 }
  0x61   : > { %435 = vmatprep.subr.bf16.mxu0 %v779_v13  ;;  %476 = vmatprep.subr.bf16.mxu1 %v781_v14  ;;  %v214_v33 = vld [vmem:[%s1108_s4] sm:$0xf]  ;;  %s212_s25 = scalar_lea.vmem [#allocation8], %s648_s18  ;;  %s1124_s5 = scalar_lea.hbm %s1164_s3, %s690_s20 }
  0x62   : > { %v251_v36 = vsub.s32 0, %v250_v35  ;;  %v259_v37 = vsub.s32 2, %v250_v35  ;;  %v255_v39 = vsub.s32 1, %v250_v35  ;;  %v263_v40 = vsub.s32 3, %v250_v35  ;;  %s548_s27 = sshll.u32 %s212_s25, 4  ;;  %s534_s16 = scalar_lea.sflag [#allocation4], %s1104_s24  ;;  %s549_s27 = int_to_ptr.vmem [resolvable:$true] %s548_s27 }
  0x63   : > { %s889_s6 = scalar_lea.vmem %s549_s27, 256  ;;  %p1180_p11 = scmp.ne.s32.totalorder %s1174_s10, 0 }
  0x64   : > { %436 = vmatpush1.bf16.msra.mxu0 %v783_v15  ;;  %477 = vmatpush1.bf16.msra.mxu1 %v784_v16  ;;  %v252_v41 = vrot.slane %v247_v38, %v251_v36  ;;  %v260_v42 = vrot.slane %v247_v38, %v259_v37  ;;  %v256_v43 = vrot.slane %v247_v38, %v255_v39  ;;  %p890_p3 = scmp.ne.s32.totalorder %s549_s27, %s889_s6  ;;  %s965_s8 = smov [#allocation8]  }
  0x65   : > { %437 = vmatprep.subr.bf16.mxu0 %v785_v17  ;;  %478 = vmatprep.subr.bf16.mxu1 %v787_v18  ;;  %v264_v44 = vrot.slane %v247_v38, %v263_v40  ;;  %s893_s9 = sshll.u32 %s965_s8, 4  ;;  %s894_s9 = int_to_ptr.vmem [resolvable:$false] %s893_s9 }
  0x66   : > { %p891_p1 = pnand %p890_p3, %p1180_p11  ;;  %s895_s21 = scalar_lea.vmem %s894_s9, 512 }
  0x67   : > { %p896_p6 = scmp.lt.s32.totalorder %s549_s27, %s894_s9  ;;  %p897_p12 = scmp.lt.s32.totalorder %s895_s21, %s889_s6 }
  0x68   : > { %438 = vmatpush1.bf16.msra.mxu0 %v789_v19  ;;  %479 = vmatpush1.bf16.msra.mxu1 %v790_v20  ;;  %p892_p2 = pneg %p891_p1 }
  0x69   : > { %439 = vmatprep.subr.bf16.mxu0 %v791_v21  ;;  %480 = vmatprep.subr.bf16.mxu1 %v793_v22  ;;  %p898_p7 = por %p897_p12, %p896_p6 }
  0x6b   : > { %p899_p9 = pnand %p898_p7, %p892_p2 }
  0x6c   : > { %440 = vmatpush1.bf16.msra.mxu0 %v795_v23  ;;  %481 = vmatpush1.bf16.msra.mxu1 %v796_v24 }
  0x6d   : > { %441 = vmatprep.subr.bf16.mxu0 %v797_v25  ;;  %482 = vmatprep.subr.bf16.mxu1 %v799_v26 }
  0x70   : > { %442 = vmatpush1.bf16.msra.mxu0 %v801_v27  ;;  %483 = vmatpush1.bf16.msra.mxu1 %v802_v28 }
  0x71   : > { %443 = vmatprep.subr.bf16.mxu0 %v803_v29  ;;  %484 = vmatprep.subr.bf16.mxu1 %v805_v30 }
  0x74   : > { %444 = vmatpush1.bf16.msra.mxu0 %v807_v31  ;;  %485 = vmatpush1.bf16.msra.mxu1 %v808_v32 }
  0x77   : > { %462 = vmatmul.mubr.bf16.vlgmr.msra.gmra.mxu0 %v214_v33  ;;  %503 = vmatmul.mubr.bf16.vlgmr.msra.gmra.mxu1 %v214_v33 }
 0x137   : > { %v463_v45 = vpop.f32.mrf.mxu0  ;;  %v504_v46 = vpop.f32.mrf.mxu1 }
 0x138   : > { %v464_v47 = vadd.f32 %v463_v45, %v252_v41  ;;  %v505_v48 = vadd.f32 %v504_v46, %v260_v42 }
 0x139   : > { %v465_v49 = vpop.f32.mrf.mxu0  ;;  %v506_v50 = vpop.f32.mrf.mxu1 }
 0x13a   : > { %v466_v51 = vadd.f32 %v465_v49, %v256_v43  ;;  %v507_v52 = vadd.f32 %v506_v50, %v264_v44  ;;  %v511_v55 = vmax.f32 %v464_v47, 0.0  ;;  %v513_v56 = vmax.f32 %v505_v48, 0.0 }
 0x13b   : > { %v467_v53 = vpop.f32.mrf.mxu0  ;;  %v508_v54 = vpop.f32.mrf.mxu1 }
 0x13c   : > { %v512_v57 = vmax.f32 %v466_v51, 0.0  ;;  %v514_v58 = vmax.f32 %v507_v52, 0.0 }
 0x13d   : > { %v468_v59 = vpop.f32.mrf.mxu0  ;;  %v509_v60 = vpop.f32.mrf.mxu1 }
 0x13e   : > { %v688_v61 = vpack.c.bf16 %v512_v57, %v511_v55  ;;  %v689_v62 = vpack.c.bf16 %v514_v58, %v513_v56 }
 0x140   : > { %531 = vst [vmem:[%s212_s25] sm:$0xff] %v688_v61  ;;  %532 = vst [vmem:[%s212_s25 + $0x8] sm:$0xff] %v689_v62 }
 0x141   : > { %902 = shalt.err (!%p899_p9)
}
 0x142   : > { %s903_s17 = scalar_lea.hbm %s1124_s5, 256  ;;  %s907_s24 = scalar_lea.hbm %s1164_s3, 512 }
 0x143   : > { %p904_p13 = scmp.ne.s32.totalorder %s1124_s5, %s903_s17  ;;  %p908_p0 = scmp.lt.s32.totalorder %s1124_s5, %s1164_s3 }
 0x144   : > { %p909_p4 = scmp.lt.s32.totalorder %s907_s24, %s903_s17 }
 0x145   : > { %p905_p5 = pnand %p904_p13, %p1180_p11 }
 0x146   : > { %p910_p8 = por %p909_p4, %p908_p0 }
 0x147   : > { %p906_p10 = pneg %p905_p5 }
 0x149   : > { %p911_p3 = pnand %p910_p8, %p906_p10 }
 0x14b   : > { %914 = shalt.err (!%p911_p3)
}
 0x14c   : > { %701 = dma.vmem_to_hbm [thread:$0]  (%p1180_p11), %s549_s27, 256, %s1124_s5, %s534_s16  }
 0x14d PF: > { %s560_s4 = sand.u32 1, %s945_s12   ;;  %p1181_p1 = scmp.ne.s32.totalorder %s1170_s19, 0 }
 0x14e   : > { %p1182_p2 = scmp.ge.s32.totalorder %s957_s15, 2  ;;  %s561_s18 = scalar_lea.sflag [#allocation4], %s560_s4 }
 0x150   : > { %p715_p6 = pnand %p1182_p2, %p1181_p1 }
 0x152   : > { %p716_p12 = pneg %p715_p6 }
 0x154   : > { %940 = dma.done.wait (%p716_p12), %s561_s18, 256  }
 0x155   : > { %942 = vsyncadd (%p716_p12), %s561_s18, 4294967040  ;;  %p17_p7 = scmp.ge.s32.totalorder %s1058_s7, 4   ;;  %s1183_s12 = smov %s949_s13 }
 0x156   : > { %s1184_s13 = smov %s953_s14  ;;  %s1185_s14 = smov %s1074_s11 }
 0x157   : > { %s1186_s15 = smov %s1058_s7  ;;  %19 = sbr.rel (!%p17_p7) target bundleno = 6 (0x6), region = 85 }
 0x15c   :  { %566 = vsyncpa [#allocation3], 1 }
 0x15d   :  { %568 = vsyncpa [#allocation3 + $0x1], 1 }
 0x15e   :  { %569 = vsyncpa [#allocation6], 1 }
 0x15f   :  { %570 = vsyncpa [#allocation4], 1 }
 0x160   :  { %572 = vsyncpa [#allocation4 + $0x1], 1 }

</bundles_post_ra>
